<compile_context>
chip_gen: v5e
topology: v5e:2x2
jax: 0.10.0
libtpu: 0.0.40
codegen_flags: <defaults>
</compile_context>

<pallas_src>
import jax
import jax.numpy as jnp
from jax.experimental import pallas as pl
from jax.experimental.pallas import tpu as pltpu

INPUT_DIM = 1
HIDDEN_DIM = 64
OUTPUT_DIM = 1
NUM_LAYERS = 3  # -> 3 hidden linears (with ReLU) + 1 output linear

_LANE = 128


def _round_up(n, m):
    return ((n + m - 1) // m) * m


def _mlp_kernel(x_ref,
                w1_ref, b1_ref,
                w2_ref, b2_ref,
                w3_ref, b3_ref,
                w4_ref, b4_ref,
                o_ref):
    """Fused MLP on one batch tile, transposed layout (features x batch)."""
    x = x_ref[...]                                   # (1, TB) f32, batch on lanes

    # Layer 1: in_features == 1 -> outer product on the VPU (no K=1 MXU matmul).
    h = jnp.maximum(w1_ref[...] * x + b1_ref[...], 0.0)          # (H,1)*(1,TB)+(H,1) -> (H,TB)

    # Layers 2 & 3: 64x64 matmuls on the MXU, f32 accumulation.
    cdt = w2_ref.dtype                               # f32, or bf16 on v6e/v7x
    h = jnp.dot(w2_ref[...], h.astype(cdt),
                preferred_element_type=jnp.float32) + b2_ref[...]
    h = jnp.maximum(h, 0.0)
    h = jnp.dot(w3_ref[...], h.astype(cdt),
                preferred_element_type=jnp.float32) + b3_ref[...]
    h = jnp.maximum(h, 0.0)

    # Layer 4: out_features == 1 -> VPU multiply + sublane (XLU) reduction.
    y = jnp.sum(h * w4_ref[...], axis=0, keepdims=True) + b4_ref[...]   # (1, TB)
    o_ref[...] = y.astype(o_ref.dtype)


def feedforward_nn(x, params, *, tile_b=2048, use_bf16=False):
    """Forward pass of FeedForwardNN.

    x        : (B, 1) float32 (same as the PyTorch module).
    params   : dict in PyTorch layout:
               w1 (H,1)  b1 (H,)   w2,w3 (H,H)  b2,b3 (H,)   w4 (1,H)  b4 (1,)
    tile_b   : batch tile; rounded up to a multiple of 128 (1024-4096 recommended).
    use_bf16 : cast the two 64x64 weight matrices / activations to bf16 for the
               MXU matmuls (f32 accumulate).  Recommended on v6e/v7x; keep f32 on v5e.
    """
    H = HIDDEN_DIM
    B = x.shape[0]
    assert x.shape == (B, INPUT_DIM)

    tile = min(_round_up(tile_b, _LANE), _round_up(B, _LANE))
    bp = _round_up(B, tile)
    grid = (bp // tile,)

    # Lane-dense (1, B) row; pad batch up to a multiple of the tile.
    xr = x.reshape(1, B).astype(jnp.float32)
    if bp != B:
        xr = jnp.pad(xr, ((0, 0), (0, bp - B)))

    mm_dt = jnp.bfloat16 if use_bf16 else jnp.float32
    w1 = params["w1"].reshape(H, 1).astype(jnp.float32)       # (H, 1) column
    b1 = params["b1"].reshape(H, 1).astype(jnp.float32)
    w2 = params["w2"].astype(mm_dt)                           # (H, H), PyTorch (out, in)
    b2 = params["b2"].reshape(H, 1).astype(jnp.float32)
    w3 = params["w3"].astype(mm_dt)
    b3 = params["b3"].reshape(H, 1).astype(jnp.float32)
    w4 = params["w4"].reshape(H, 1).astype(jnp.float32)       # (1, H) -> (H, 1) column
    b4 = params["b4"].reshape(1, 1).astype(jnp.float32)

    def const_spec(shape):
        # Full block + constant index_map -> DMA'd once, stays resident in VMEM.
        return pl.BlockSpec(shape, lambda i: (0, 0))

    x_spec = pl.BlockSpec((1, tile), lambda i: (0, i))
    o_spec = pl.BlockSpec((1, tile), lambda i: (0, i))

    out = pl.pallas_call(
        _mlp_kernel,
        out_shape=jax.ShapeDtypeStruct((1, bp), jnp.float32),
        grid_spec=pltpu.PrefetchScalarGridSpec(
            num_scalar_prefetch=0,
            grid=grid,
            in_specs=[x_spec,
                      const_spec((H, 1)), const_spec((H, 1)),
                      const_spec((H, H)), const_spec((H, 1)),
                      const_spec((H, H)), const_spec((H, 1)),
                      const_spec((H, 1)), const_spec((1, 1))],
            out_specs=o_spec,
        ),
        compiler_params=pltpu.CompilerParams(
            dimension_semantics=("parallel",)),
    )(xr, w1, b1, w2, b2, w3, b3, w4, b4)

    return out.reshape(bp, 1)[:B]


def init_params(key):
    """PyTorch nn.Linear init: weight (out, in), bias (out,), both U(-1/sqrt(in), 1/sqrt(in))."""
    keys = jax.random.split(key, 8)

    def linear(kw, kb, fan_in, fan_out):
        bound = 1.0 / (float(fan_in) ** 0.5)
        w = jax.random.uniform(kw, (fan_out, fan_in), jnp.float32, -bound, bound)
        b = jax.random.uniform(kb, (fan_out,), jnp.float32, -bound, bound)
        return w, b

    w1, b1 = linear(keys[0], keys[1], INPUT_DIM, HIDDEN_DIM)
    w2, b2 = linear(keys[2], keys[3], HIDDEN_DIM, HIDDEN_DIM)
    w3, b3 = linear(keys[4], keys[5], HIDDEN_DIM, HIDDEN_DIM)
    w4, b4 = linear(keys[6], keys[7], HIDDEN_DIM, OUTPUT_DIM)
    return {"w1": w1, "b1": b1, "w2": w2, "b2": b2,
            "w3": w3, "b3": b3, "w4": w4, "b4": b4}


def _reference(x, p):
    hp = jax.lax.Precision.HIGHEST
    h = jnp.maximum(x @ p["w1"].T + p["b1"], 0.0)
    h = jnp.maximum(jnp.dot(h, p["w2"].T, precision=hp) + p["b2"], 0.0)
    h = jnp.maximum(jnp.dot(h, p["w3"].T, precision=hp) + p["b3"], 0.0)
    return jnp.dot(h, p["w4"].T, precision=hp) + p["b4"]


if __name__ == "__main__":
    key = jax.random.PRNGKey(0)
    k_params, k_x = jax.random.split(key)

    params = init_params(k_params)

    # B deliberately not a multiple of 128 (exercises padding); tile_b=256 gives
    # a 4-step parallel grid even at this small size.
    B = 1000
    x = jax.random.normal(k_x, (B, INPUT_DIM), jnp.float32)

    ref = _reference(x, params)

    # f32 path (all generations; the v5e recommendation).
    out = feedforward_nn(x, params, tile_b=256, use_bf16=False)
    out = jax.block_until_ready(out)
    assert out.shape == (B, OUTPUT_DIM)
    assert jnp.allclose(out, ref, atol=3e-5, rtol=3e-5), \
        float(jnp.max(jnp.abs(out - ref)))

    # bf16 operands for the two 64x64 MXU matmuls (the v6e/v7x recommendation).
    out_bf = feedforward_nn(x, params, tile_b=256, use_bf16=True)
    out_bf = jax.block_until_ready(out_bf)
    assert out_bf.shape == (B, OUTPUT_DIM)
    assert jnp.allclose(out_bf, ref, atol=5e-2, rtol=5e-2), \
        float(jnp.max(jnp.abs(out_bf - ref)))

    print("KERNEL_OK")
</pallas_src>

<mosaic_0001>
module attributes {stable_mosaic.version = 11 : i64} {
  func.func @_mlp_kernel(%arg0: i32, %arg1: memref<1x256xf32, #tpu.memory_space<vmem>>, %arg2: memref<64x1xf32, #tpu.memory_space<vmem>>, %arg3: memref<64x1xf32, #tpu.memory_space<vmem>>, %arg4: memref<64x64xf32, #tpu.memory_space<vmem>>, %arg5: memref<64x1xf32, #tpu.memory_space<vmem>>, %arg6: memref<64x64xf32, #tpu.memory_space<vmem>>, %arg7: memref<64x1xf32, #tpu.memory_space<vmem>>, %arg8: memref<64x1xf32, #tpu.memory_space<vmem>>, %arg9: memref<1x1xf32, #tpu.memory_space<vmem>>, %arg10: memref<1x256xf32, #tpu.memory_space<vmem>>) attributes {dimension_semantics = [#tpu.dimension_semantics<parallel>], iteration_bounds = array<i64: 4>, scalar_prefetch = 0 : i64, scratch_operands = 0 : i64, tpu.core_type = #tpu.core_type<tc>, window_params = [{transform_indices = @transform_0, window_bounds = array<i64: 1, 256>}, {pipeline_mode = #tpu.pipeline_mode<synchronous>, transform_indices = @transform_1, window_bounds = array<i64: 64, 1>}, {pipeline_mode = #tpu.pipeline_mode<synchronous>, transform_indices = @transform_2, window_bounds = array<i64: 64, 1>}, {pipeline_mode = #tpu.pipeline_mode<synchronous>, transform_indices = @transform_3, window_bounds = array<i64: 64, 64>}, {pipeline_mode = #tpu.pipeline_mode<synchronous>, transform_indices = @transform_4, window_bounds = array<i64: 64, 1>}, {pipeline_mode = #tpu.pipeline_mode<synchronous>, transform_indices = @transform_5, window_bounds = array<i64: 64, 64>}, {pipeline_mode = #tpu.pipeline_mode<synchronous>, transform_indices = @transform_6, window_bounds = array<i64: 64, 1>}, {pipeline_mode = #tpu.pipeline_mode<synchronous>, transform_indices = @transform_7, window_bounds = array<i64: 64, 1>}, {pipeline_mode = #tpu.pipeline_mode<synchronous>, transform_indices = @transform_8, window_bounds = array<i64: 1, 1>}, {transform_indices = @transform_9, window_bounds = array<i64: 1, 256>}]} {
    %c0 = arith.constant 0 : index
    %c0_0 = arith.constant 0 : index
    %0 = vector.load %arg1[%c0, %c0_0] : memref<1x256xf32, #tpu.memory_space<vmem>>, vector<1x256xf32>
    %c0_1 = arith.constant 0 : index
    %c0_2 = arith.constant 0 : index
    %1 = vector.load %arg2[%c0_1, %c0_2] : memref<64x1xf32, #tpu.memory_space<vmem>>, vector<64x1xf32>
    %2 = vector.broadcast %1 : vector<64x1xf32> to vector<64x256xf32>
    %3 = vector.broadcast %0 : vector<1x256xf32> to vector<64x256xf32>
    %4 = arith.mulf %2, %3 : vector<64x256xf32>
    %c0_3 = arith.constant 0 : index
    %c0_4 = arith.constant 0 : index
    %5 = vector.load %arg3[%c0_3, %c0_4] : memref<64x1xf32, #tpu.memory_space<vmem>>, vector<64x1xf32>
    %6 = vector.broadcast %5 : vector<64x1xf32> to vector<64x256xf32>
    %7 = arith.addf %4, %6 : vector<64x256xf32>
    %cst = arith.constant 0.000000e+00 : f32
    %8 = vector.broadcast %cst : f32 to vector<64x256xf32>
    %9 = arith.maximumf %7, %8 : vector<64x256xf32>
    %c0_5 = arith.constant 0 : index
    %c0_6 = arith.constant 0 : index
    %10 = vector.load %arg4[%c0_5, %c0_6] : memref<64x64xf32, #tpu.memory_space<vmem>>, vector<64x64xf32>
    %cst_7 = arith.constant dense<0.000000e+00> : vector<64x256xf32>
    %11 = tpu.matmul %10, %9, %cst_7 {dimension_numbers = #tpu.dot_dimension_numbers<[1], [0], [0], [1], [0, 0, 1, 1], [], []>} : vector<64x64xf32>, vector<64x256xf32>, vector<64x256xf32> -> vector<64x256xf32>
    %c0_8 = arith.constant 0 : index
    %c0_9 = arith.constant 0 : index
    %12 = vector.load %arg5[%c0_8, %c0_9] : memref<64x1xf32, #tpu.memory_space<vmem>>, vector<64x1xf32>
    %13 = vector.broadcast %12 : vector<64x1xf32> to vector<64x256xf32>
    %14 = arith.addf %11, %13 : vector<64x256xf32>
    %cst_10 = arith.constant 0.000000e+00 : f32
    %15 = vector.broadcast %cst_10 : f32 to vector<64x256xf32>
    %16 = arith.maximumf %14, %15 : vector<64x256xf32>
    %c0_11 = arith.constant 0 : index
    %c0_12 = arith.constant 0 : index
    %17 = vector.load %arg6[%c0_11, %c0_12] : memref<64x64xf32, #tpu.memory_space<vmem>>, vector<64x64xf32>
    %cst_13 = arith.constant dense<0.000000e+00> : vector<64x256xf32>
    %18 = tpu.matmul %17, %16, %cst_13 {dimension_numbers = #tpu.dot_dimension_numbers<[1], [0], [0], [1], [0, 0, 1, 1], [], []>} : vector<64x64xf32>, vector<64x256xf32>, vector<64x256xf32> -> vector<64x256xf32>
    %c0_14 = arith.constant 0 : index
    %c0_15 = arith.constant 0 : index
    %19 = vector.load %arg7[%c0_14, %c0_15] : memref<64x1xf32, #tpu.memory_space<vmem>>, vector<64x1xf32>
    %20 = vector.broadcast %19 : vector<64x1xf32> to vector<64x256xf32>
    %21 = arith.addf %18, %20 : vector<64x256xf32>
    %cst_16 = arith.constant 0.000000e+00 : f32
    %22 = vector.broadcast %cst_16 : f32 to vector<64x256xf32>
    %23 = arith.maximumf %21, %22 : vector<64x256xf32>
    %c0_17 = arith.constant 0 : index
    %c0_18 = arith.constant 0 : index
    %24 = vector.load %arg8[%c0_17, %c0_18] : memref<64x1xf32, #tpu.memory_space<vmem>>, vector<64x1xf32>
    %25 = vector.broadcast %24 : vector<64x1xf32> to vector<64x256xf32>
    %26 = arith.mulf %23, %25 : vector<64x256xf32>
    %cst_19 = arith.constant dense<0.000000e+00> : vector<256xf32>
    %27 = vector.multi_reduction <add>, %26, %cst_19 [0] : vector<64x256xf32> to vector<256xf32>
    %28 = vector.shape_cast %27 : vector<256xf32> to vector<1x256xf32>
    %c0_20 = arith.constant 0 : index
    %c0_21 = arith.constant 0 : index
    %29 = vector.load %arg9[%c0_20, %c0_21] : memref<1x1xf32, #tpu.memory_space<vmem>>, vector<1x1xf32>
    %30 = vector.broadcast %29 : vector<1x1xf32> to vector<1x256xf32>
    %31 = arith.addf %28, %30 : vector<1x256xf32>
    %c0_22 = arith.constant 0 : index
    %c0_23 = arith.constant 0 : index
    %32 = vector.load %arg10[%c0_22, %c0_23] : memref<1x256xf32, #tpu.memory_space<vmem>>, vector<1x256xf32>
    tpu.vector_store %arg10[%c0_22, %c0_23], %31 {strides = array<i32>} : memref<1x256xf32, #tpu.memory_space<vmem>>, vector<1x256xf32>,
    return
  }
  func.func @transform_0(%arg0: i32) -> (i32, i32) {
    %c0_i32 = arith.constant 0 : i32
    %c0_i32_0 = arith.constant 0 : i32
    return %c0_i32, %arg0 : i32, i32
  }
  func.func @transform_1(%arg0: i32) -> (i32, i32) {
    %c0_i32 = arith.constant 0 : i32
    %c0_i32_0 = arith.constant 0 : i32
    %c0_i32_1 = arith.constant 0 : i32
    return %c0_i32, %c0_i32_0 : i32, i32
  }
  func.func @transform_2(%arg0: i32) -> (i32, i32) {
    %c0_i32 = arith.constant 0 : i32
    %c0_i32_0 = arith.constant 0 : i32
    %c0_i32_1 = arith.constant 0 : i32
    return %c0_i32, %c0_i32_0 : i32, i32
  }
  func.func @transform_3(%arg0: i32) -> (i32, i32) {
    %c0_i32 = arith.constant 0 : i32
    %c0_i32_0 = arith.constant 0 : i32
    %c0_i32_1 = arith.constant 0 : i32
    return %c0_i32, %c0_i32_0 : i32, i32
  }
  func.func @transform_4(%arg0: i32) -> (i32, i32) {
    %c0_i32 = arith.constant 0 : i32
    %c0_i32_0 = arith.constant 0 : i32
    %c0_i32_1 = arith.constant 0 : i32
    return %c0_i32, %c0_i32_0 : i32, i32
  }
  func.func @transform_5(%arg0: i32) -> (i32, i32) {
    %c0_i32 = arith.constant 0 : i32
    %c0_i32_0 = arith.constant 0 : i32
    %c0_i32_1 = arith.constant 0 : i32
    return %c0_i32, %c0_i32_0 : i32, i32
  }
  func.func @transform_6(%arg0: i32) -> (i32, i32) {
    %c0_i32 = arith.constant 0 : i32
    %c0_i32_0 = arith.constant 0 : i32
    %c0_i32_1 = arith.constant 0 : i32
    return %c0_i32, %c0_i32_0 : i32, i32
  }
  func.func @transform_7(%arg0: i32) -> (i32, i32) {
    %c0_i32 = arith.constant 0 : i32
    %c0_i32_0 = arith.constant 0 : i32
    %c0_i32_1 = arith.constant 0 : i32
    return %c0_i32, %c0_i32_0 : i32, i32
  }
  func.func @transform_8(%arg0: i32) -> (i32, i32) {
    %c0_i32 = arith.constant 0 : i32
    %c0_i32_0 = arith.constant 0 : i32
    %c0_i32_1 = arith.constant 0 : i32
    return %c0_i32, %c0_i32_0 : i32, i32
  }
  func.func @transform_9(%arg0: i32) -> (i32, i32) {
    %c0_i32 = arith.constant 0 : i32
    %c0_i32_0 = arith.constant 0 : i32
    return %c0_i32, %arg0 : i32, i32
  }
}

</mosaic_0001>

<bundles_post_ra>
// kernel: tpu_custom_call.1
= control target key start
LH: loop header
LB: loop body
LE: loop exit
PB: predicated region body
PF: predicated region fallthrough
CT: control target
= control target key end

     0   :  { %s1533_s0 = inlined_call_operand.vmem [shape: f32[1,1024], index: 0, kind: input, shape index: {}]   ;;  %s1534_s1 = inlined_call_operand.vmem [shape: f32[64,1], index: 1, kind: input, shape index: {}]   ;;  %s1535_s2 = inlined_call_operand.vmem [shape: f32[64,1], index: 2, kind: input, shape index: {}]   ;;  %s1536_s3 = inlined_call_operand.vmem [shape: f32[64,64], index: 3, kind: input, shape index: {}]   ;;  %s1537_s4 = inlined_call_operand.vmem [shape: f32[64,1], index: 4, kind: input, shape index: {}]   ;;  %s1538_s5 = inlined_call_operand.vmem [shape: f32[64,64], index: 5, kind: input, shape index: {}]   ;;  %s1539_s6 = inlined_call_operand.vmem [shape: f32[64,1], index: 6, kind: input, shape index: {}]   ;;  %s1540_s7 = inlined_call_operand.vmem [shape: f32[64,1], index: 7, kind: input, shape index: {}]   ;;  %s1541_s8 = inlined_call_operand.<no memory space> [shape: f32[1,1], index: 8, kind: input, shape index: {}]   ;;  %s1542_s9 = inlined_call_operand.hbm [shape: f32[1,1024], index: 9, kind: output, shape index: {}]  }
   0x1   :  { %v14_v0 = vstv %s1541_s8 }
   0x2   :  { %15 = vst [vmem:[#allocation2] sm:$0x1] %v14_v0 }
   0x3   :  { %16 = vsyncpa [#allocation4], 0 }
   0x4   :  { %18 = vsyncpa [#allocation4 + $0x1], 0  ;;  %s1225_s11 = smov 0   ;;  %s1227_s12 = smov 0  }
   0x5   :  { %s1229_s13 = smov 0   ;;  %s1231_s14 = smov 0  }
   0x6 LB: > { %s1021_s8 = sadd.s32 4294967295, %s1169_s14   ;;  %s1022_s15 = sadd.s32 4294967294, %s1169_s14   ;;  %s1169_s14 = sphi %s1231_s14, %s1548_s14   ;;  %s1165_s13 = sphi %s1229_s13, %s1547_s13   ;;  %s1161_s12 = sphi %s1227_s12, %s1546_s12   ;;  %s1157_s11 = sphi %s1225_s11, %s1545_s11  }
   0x7   : > { %s1248_s16 = sadd.s32 1, %s1169_s14   ;;  %s225_s17 = sadd.s32 1, %s1165_s13 }
   0x8   : > { %s222_s18 = ssub.s32 %s1169_s14, %s1248_s16  ;;  %p235_p0 = scmp.ne.s32.totalorder %s1165_s13, %s1161_s12 }
   0x9   : > { %p223_p1 = scmp.eq.s32.totalorder %s222_s18, 0  ;;  %p236_p2 = scmp.eq.s32.totalorder %s1021_s8, 3 }
   0xa   : > { %p241_p3 = scmp.ne.s32.totalorder %s1161_s12, %s1157_s11  ;;  %p242_p4 = scmp.eq.s32.totalorder %s1022_s15, 3 }
   0xb   : > { %s1260_s19 = scalar_select %p223_p1, %s1165_s13, %s225_s17  }
   0xc   : > { %p1262_p5 = por %p236_p2, %p235_p0  ;;  %p1266_p6 = por %p242_p4, %p241_p3 }
   0xd   : > { %p1025_p7 = scmp.ge.s32.totalorder %s1169_s14, 1  ;;  %p292_p8 = scmp.lt.s32.totalorder %s1169_s14, 5 }
   0xf   : > { %p293_p9 = pnand %p1025_p7, %p292_p8 }
  0x10   : > { %s1391_s22 = sshll.u32 (!%p293_p9), %s1021_s8, 1  ;;  %s324_s18 = sand.u32 (!%p293_p9), 1, %s1161_s12  }
  0x11   : > { %296 = sbr.rel (%p293_p9) target bundleno = 602 (0x25a), region = 56  ;;  %p328_p10 = scmp.lt.s32.totalorder (!%p293_p9), %s1391_s22, 7 }
  0x12   : > { %s961_s26 = scalar_lea.hbm (!%p293_p9), %s1542_s9, %s1391_s22  ;;  %s951_s29 = scalar_lea.sflag (!%p293_p9), [#allocation4], %s324_s18 }
  0x13   : > { %s965_s28 = sshll.u32 (!%p293_p9), %s961_s26, 4  ;;  %s1127_s17 = scalar_lea.hbm (!%p293_p9), %s1542_s9, 8  ;;  %s966_s28 = int_to_ptr.hbm [resolvable:$true] %s965_s28 }
  0x14   : > { %s1121_s30 = sshra.s32 (!%p293_p9), %s966_s28, 4  ;;  %s1122_s30 = int_to_ptr.hbm [resolvable:$true] %s1121_s30 }
  0x15   : > { %p1128_p0 = scmp.lt.s32.totalorder (!%p293_p9), %s1122_s30, %s1542_s9 }
  0x16   : > { %v409_v1 = vld [vmem:[%s1535_s2 + $0x30] sm:$0xff]  ;;  %v410_v2 = vld [vmem:[%s1535_s2 + $0x38] sm:$0xff]  ;;  %v1171_v4 = vmov 0   ;;  %v338_v5 = vld [vmem:[%s1534_s1 + $0x20] sm:$0xff]  ;;  %s329_s23 = scalar_select %p328_p10, %s1391_s22, 7  ;;  %vm539_vm0 = vcmask 523264  }
  0x17   : > { %v341_v3 = vld [vmem:[%s1534_s1 + $0x38] sm:$0xff]  ;;  %1106 = vset.pattern.permute.xlu2 %v1171_v4  ;;  %1105 = vset.pattern.permute.xlu1 %v1171_v4  ;;  %v340_v6 = vld [vmem:[%s1534_s1 + $0x30] sm:$0xff]  ;;  %v339_v7 = vld [vmem:[%s1534_s1 + $0x28] sm:$0xff]  ;;  %vm942_vm1 = vcmask 1040384   ;;  %s1123_s22 = scalar_lea.hbm %s1122_s30, 2 }
  0x18   : > { %1104 = vset.pattern.permute.xlu0 %v1171_v4  ;;  %443 = vperm.xlu2 %1106, %v409_v1   ;;  %v407_v8 = vld [vmem:[%s1535_s2 + $0x20] sm:$0xff]  ;;  %v408_v9 = vld [vmem:[%s1535_s2 + $0x28] sm:$0xff]  ;;  %v337_v10 = vld [vmem:[%s1534_s1 + $0x18] sm:$0xff]  ;;  %s330_s8 = scalar_lea.vmem %s1533_s0, %s329_s23  ;;  %s1026_s23 = sshll.u32 %s324_s18, 1 }
  0x19   : > { %448 = vperm.xlu1 %1105, %v410_v2   ;;  %379 = vperm.xlu0 %1104, %v341_v3   ;;  %v335_v11 = vld [vmem:[%s1534_s1 + $0x8] sm:$0xff]  ;;  %v406_v12 = vld [vmem:[%s1535_s2 + $0x18] sm:$0xff]  ;;  %v336_v13 = vld [vmem:[%s1534_s1 + $0x10] sm:$0xff]  ;;  %s326_s27 = scalar_lea.vmem [#allocation3], %s1026_s23  ;;  %p1124_p11 = scmp.ne.s32.totalorder %s1122_s30, %s1123_s22 }
  0x1a   : > { %v404_v14 = vld [vmem:[%s1535_s2 + $0x8] sm:$0xff]  ;;  %v405_v15 = vld [vmem:[%s1535_s2 + $0x10] sm:$0xff]  ;;  %v334_v16 = vld [vmem:[%s1534_s1] sm:$0xff]  ;;  %p1129_p1 = scmp.lt.s32.totalorder %s1127_s17, %s1123_s22 }
  0x1b   : > { %v497_v17 = vld [vmem:[%s1537_s4 + $0x30] sm:$0xff]  ;;  %v403_v18 = vld [vmem:[%s1535_s2] sm:$0xff]  ;;  %v498_v19 = vld [vmem:[%s1537_s4 + $0x38] sm:$0xff]  ;;  %p1125_p12 = pnand %p1124_p11, %p1262_p5 }
  0x1c   : > { %v494_v20 = vld [vmem:[%s1537_s4 + $0x18] sm:$0xff]  ;;  %v496_v21 = vld [vmem:[%s1537_s4 + $0x28] sm:$0xff]  ;;  %v495_v22 = vld [vmem:[%s1537_s4 + $0x20] sm:$0xff]  ;;  %p1130_p2 = por %p1129_p1, %p1128_p0 }
  0x1d   : > { %v491_v23 = vld [vmem:[%s1537_s4] sm:$0xff]  ;;  %v493_v24 = vld [vmem:[%s1537_s4 + $0x10] sm:$0xff]  ;;  %v492_v25 = vld [vmem:[%s1537_s4 + $0x8] sm:$0xff]  ;;  %p1126_p13 = pneg %p1125_p12 }
  0x1e   : > { %v672_v26 = vld [vmem:[%s1539_s6 + $0x10] sm:$0xff]  ;;  %v670_v27 = vld [vmem:[%s1539_s6] sm:$0xff]  ;;  %v671_v28 = vld [vmem:[%s1539_s6 + $0x8] sm:$0xff] }
  0x1f   : > { %v840_v29 = vld [vmem:[%s1540_s7] sm:$0xff]  ;;  %v673_v30 = vld [vmem:[%s1539_s6 + $0x18] sm:$0xff]  ;;  %v675_v32 = vld [vmem:[%s1539_s6 + $0x28] sm:$0xff]  ;;  %p1131_p3 = pnand %p1130_p2, %p1126_p13 }
  0x20   : > { %364 = vperm.xlu2 %1106, %v338_v5   ;;  %v674_v31 = vld [vmem:[%s1539_s6 + $0x20] sm:$0xff]  ;;  %v841_v33 = vld [vmem:[%s1540_s7 + $0x8] sm:$0xff]  ;;  %v842_v34 = vld [vmem:[%s1540_s7 + $0x10] sm:$0xff] }
  0x21   : > { %374 = vperm.xlu0 %1104, %v340_v6   ;;  %369 = vperm.xlu1 %1105, %v339_v7   ;;  %v844_v35 = vld [vmem:[%s1540_s7 + $0x20] sm:$0xff]  ;;  %v843_v36 = vld [vmem:[%s1540_s7 + $0x18] sm:$0xff]  ;;  %v676_v37 = vld [vmem:[%s1539_s6 + $0x30] sm:$0xff] }
  0x22   : > { %v846_v38 = vld [vmem:[%s1540_s7 + $0x30] sm:$0xff]  ;;  %v677_v39 = vld [vmem:[%s1539_s6 + $0x38] sm:$0xff]  ;;  %v845_v40 = vld [vmem:[%s1540_s7 + $0x28] sm:$0xff] }
  0x23   : > { %v847_v41 = vld [vmem:[%s1540_s7 + $0x38] sm:$0xff]  ;;  %v930_v42 = vld [vmem:[#allocation2] sm:$0x1] }
  0x24   : > { %v333_v44 = vld [vmem:[%s330_s8] sm:$0x3]  ;;  %s963_s8 = sshll.u32 %s326_s27, 4  ;;  %s964_s8 = int_to_ptr.vmem [resolvable:$true] %s963_s8 }
  0x25   : > { %v1401_v45 = vperm.slane %v333_v44, 0  ;;  %v1403_v46 = vperm.slane %v333_v44, 1 }
  0x28   : > { %433 = vperm.xlu2 %1106, %v407_v8  }
  0x29   : > { %438 = vperm.xlu0 %1104, %v408_v9   ;;  %359 = vperm.xlu1 %1105, %v337_v10  }
  0x30   : > { %349 = vperm.xlu2 %1106, %v335_v11  }
  0x31   : > { %428 = vperm.xlu1 %1105, %v406_v12   ;;  %354 = vperm.xlu0 %1104, %v336_v13  }
  0x38   : > { %418 = vperm.xlu2 %1106, %v404_v14  }
  0x39   : > { %423 = vperm.xlu0 %1104, %v405_v15   ;;  %344 = vperm.xlu1 %1105, %v334_v16  }
  0x40   : > { %531 = vperm.xlu2 %1106, %v497_v17  }
  0x41   : > { %413 = vperm.xlu0 %1104, %v403_v18   ;;  %536 = vperm.xlu1 %1105, %v498_v19  }
  0x48   : > { %516 = vperm.xlu2 %1106, %v494_v20  }
  0x49   : > { %526 = vperm.xlu0 %1104, %v496_v21   ;;  %521 = vperm.xlu1 %1105, %v495_v22  }
  0x50   : > { %501 = vperm.xlu2 %1106, %v491_v23  }
  0x51   : > { %511 = vperm.xlu0 %1104, %v493_v24   ;;  %506 = vperm.xlu1 %1105, %v492_v25  }
  0x58   : > { %690 = vperm.xlu2 %1106, %v672_v26  }
  0x59   : > { %680 = vperm.xlu0 %1104, %v670_v27   ;;  %685 = vperm.xlu1 %1105, %v671_v28  }
  0x60   : > { %850 = vperm.xlu2 %1106, %v840_v29  }
  0x61   : > { %695 = vperm.xlu0 %1104, %v673_v30   ;;  %700 = vperm.xlu1 %1105, %v674_v31  }
  0x68   : > { %705 = vperm.xlu2 %1106, %v675_v32  }
  0x69   : > { %855 = vperm.xlu0 %1104, %v841_v33   ;;  %860 = vperm.xlu1 %1105, %v842_v34  }
  0x70   : > { %870 = vperm.xlu2 %1106, %v844_v35  }
  0x71   : > { %865 = vperm.xlu0 %1104, %v843_v36   ;;  %710 = vperm.xlu1 %1105, %v676_v37  }
  0x72   : > { %v444_v43 = vpop.permute.xlu2 %443 }
  0x78   : > { %880 = vperm.xlu2 %1106, %v846_v38  }
  0x79   : > { %715 = vperm.xlu0 %1104, %v677_v39   ;;  %875 = vperm.xlu1 %1105, %v845_v40  }
  0x7a   : > { %v365_v47 = vpop.permute.xlu2 %364 }
  0x7b   : > { %v395_v63 = vmul.f32 %v1401_v45, %v365_v47  ;;  %v396_v0 = vmul.f32 %v1403_v46, %v365_v47 }
  0x81   : > { %885 = vperm.xlu0 %1104, %v847_v41   ;;  %933 = vperm.xlu1 %1105, %v930_v42  }
  0x82   : > { %v434_v60 = vpop.permute.xlu2 %433 }
  0x83   : > { %v459_v7 = vadd.f32 %v434_v60, %v395_v63  ;;  %v460_v8 = vadd.f32 %v434_v60, %v396_v0 }
  0x85   : > { %v475_v14 = vmax.f32 %v459_v7, 0.0  ;;  %v476_v15 = vmax.f32 %v460_v8, 0.0 }
  0x8a   : > { %v350_v13 = vpop.permute.xlu2 %349 }
  0x8b   : > { %v449_v48 = vpop.permute.xlu1 %448  ;;  %v380_v49 = vpop.permute.xlu0 %379  ;;  %v389_v24 = vmul.f32 %v1401_v45, %v350_v13  ;;  %v390_v25 = vmul.f32 %v1403_v46, %v350_v13 }
  0x8c   : > { %v401_v50 = vmul.f32 %v1401_v45, %v380_v49  ;;  %v402_v51 = vmul.f32 %v1403_v46, %v380_v49  ;;  %v486_v49 = vld [vmem:[%s1536_s3 + $0x18] sm:$0xff] }
  0x8e   : > { %v465_v52 = vadd.f32 %v449_v48, %v401_v50  ;;  %v466_v53 = vadd.f32 %v449_v48, %v402_v51  ;;  %v483_v48 = vld [vmem:[%s1536_s3] sm:$0xff]  ;;  %v488_v51 = vld [vmem:[%s1536_s3 + $0x28] sm:$0xff] }
  0x8f   : > { %v487_v50 = vld [vmem:[%s1536_s3 + $0x20] sm:$0xff] }
  0x90   : > { %v481_v54 = vmax.f32 %v465_v52, 0.0  ;;  %v482_v55 = vmax.f32 %v466_v53, 0.0  ;;  %v489_v52 = vld [vmem:[%s1536_s3 + $0x30] sm:$0xff]  ;;  %v490_v53 = vld [vmem:[%s1536_s3 + $0x38] sm:$0xff] }
  0x92   : > { %572 = vmatpush.msra.mxu0 %v481_v54  ;;  %613 = vmatpush.msra.mxu1 %v482_v55  ;;  %v419_v26 = vpop.permute.xlu2 %418 }
  0x93   : > { %v375_v56 = vpop.permute.xlu0 %374  ;;  %v370_v57 = vpop.permute.xlu1 %369  ;;  %v453_v30 = vadd.f32 %v419_v26, %v389_v24  ;;  %v454_v31 = vadd.f32 %v419_v26, %v390_v25 }
  0x94   : > { %v399_v58 = vmul.f32 %v1401_v45, %v375_v56  ;;  %v400_v59 = vmul.f32 %v1403_v46, %v375_v56  ;;  %v397_v3 = vmul.f32 %v1401_v45, %v370_v57  ;;  %v398_v4 = vmul.f32 %v1403_v46, %v370_v57 }
  0x95   : > { %v469_v37 = vmax.f32 %v453_v30, 0.0  ;;  %v470_v38 = vmax.f32 %v454_v31, 0.0 }
  0x96   : > { %v463_v61 = vadd.f32 %v444_v43, %v399_v58  ;;  %v464_v62 = vadd.f32 %v444_v43, %v400_v59 }
  0x98   : > { %v479_v1 = vmax.f32 %v463_v61, 0.0  ;;  %v480_v2 = vmax.f32 %v464_v62, 0.0 }
  0x9a   : > { %573 = vmatpush.msra.mxu0 %v479_v1  ;;  %614 = vmatpush.msra.mxu1 %v480_v2 }
  0x9b   : > { %v439_v5 = vpop.permute.xlu0 %438  ;;  %v360_v6 = vpop.permute.xlu1 %359 }
  0x9c   : > { %v461_v9 = vadd.f32 %v439_v5, %v397_v3  ;;  %v462_v10 = vadd.f32 %v439_v5, %v398_v4  ;;  %v393_v16 = vmul.f32 %v1401_v45, %v360_v6  ;;  %v394_v17 = vmul.f32 %v1403_v46, %v360_v6  ;;  %v532_v3 = vpop.permute.xlu2 %531 }
  0x9e   : > { %v477_v11 = vmax.f32 %v461_v9, 0.0  ;;  %v478_v12 = vmax.f32 %v462_v10, 0.0 }
  0xa0   : > { %574 = vmatpush.msra.mxu0 %v477_v11  ;;  %615 = vmatpush.msra.mxu1 %v478_v12 }
  0xa2   : > { %575 = vmatpush.msra.mxu0 %v475_v14  ;;  %616 = vmatpush.msra.mxu1 %v476_v15 }
  0xa3   : > { %v429_v18 = vpop.permute.xlu1 %428  ;;  %v355_v19 = vpop.permute.xlu0 %354 }
  0xa4   : > { %v457_v20 = vadd.f32 %v429_v18, %v393_v16  ;;  %v458_v21 = vadd.f32 %v429_v18, %v394_v17  ;;  %v391_v27 = vmul.f32 %v1401_v45, %v355_v19  ;;  %v392_v28 = vmul.f32 %v1403_v46, %v355_v19  ;;  %v517_v14 = vpop.permute.xlu2 %516 }
  0xa6   : > { %v473_v22 = vmax.f32 %v457_v20, 0.0  ;;  %v474_v23 = vmax.f32 %v458_v21, 0.0 }
  0xa8   : > { %576 = vmatpush.msra.mxu0 %v473_v22  ;;  %617 = vmatpush.msra.mxu1 %v474_v23 }
  0xab   : > { %v424_v29 = vpop.permute.xlu0 %423  ;;  %v345_v36 = vpop.permute.xlu1 %344 }
  0xac   : > { %v455_v32 = vadd.f32 %v424_v29, %v391_v27  ;;  %v456_v33 = vadd.f32 %v424_v29, %v392_v28  ;;  %v387_v39 = vmul.f32 %v1401_v45, %v345_v36  ;;  %v388_v40 = vmul.f32 %v1403_v46, %v345_v36  ;;  %v484_v45 = vld [vmem:[%s1536_s3 + $0x8] sm:$0xff]  ;;  %v485_v46 = vld [vmem:[%s1536_s3 + $0x10] sm:$0xff] }
  0xae   : > { %v471_v34 = vmax.f32 %v455_v32, 0.0  ;;  %v472_v35 = vmax.f32 %v456_v33, 0.0 }
  0xb0   : > { %577 = vmatpush.msra.mxu0 %v471_v34  ;;  %618 = vmatpush.msra.mxu1 %v472_v35 }
  0xb2   : > { %578 = vmatpush.msra.mxu0 %v469_v37  ;;  %619 = vmatpush.msra.mxu1 %v470_v38  ;;  %v502_v37 = vpop.permute.xlu2 %501 }
  0xb3   : > { %v414_v41 = vpop.permute.xlu0 %413  ;;  %v537_v2 = vpop.permute.xlu1 %536 }
  0xb4   : > { %v451_v42 = vadd.f32 %v414_v41, %v387_v39  ;;  %v452_v43 = vadd.f32 %v414_v41, %v388_v40 }
  0xb6   : > { %v467_v44 = vmax.f32 %v451_v42, 0.0  ;;  %v468_v47 = vmax.f32 %v452_v43, 0.0 }
  0xb8   : > { %579 = vmatpush.msra.mxu0 %v467_v44  ;;  %620 = vmatpush.msra.mxu1 %v468_v47 }
  0xb9   : > { %1028 = vmatmul.msk.f32.vlgmr.msra.gmra.mxu0 %vm539_vm0, %v483_v48  ;;  %1036 = vmatmul.msk.f32.vlgmr.msra.gmra.mxu1 %vm539_vm0, %v483_v48  ;;  %v662_v48 = vld [vmem:[%s1538_s5] sm:$0xff] }
  0xbb   : > { %v527_v6 = vpop.permute.xlu0 %526  ;;  %v522_v7 = vpop.permute.xlu1 %521 }
  0xc1   : > { %1029 = vmatmul.msk.f32.gmra.mxu0 %vm539_vm0, %v484_v45  ;;  %1037 = vmatmul.msk.f32.gmra.mxu1 %vm539_vm0, %v484_v45  ;;  %v663_v45 = vld [vmem:[%s1538_s5 + $0x8] sm:$0xff] }
  0xc3   : > { %v512_v27 = vpop.permute.xlu0 %511  ;;  %v507_v32 = vpop.permute.xlu1 %506 }
  0xc9   : > { %1030 = vmatmul.msk.f32.gmra.mxu0 %vm539_vm0, %v485_v46  ;;  %1038 = vmatmul.msk.f32.gmra.mxu1 %vm539_vm0, %v485_v46  ;;  %v664_v46 = vld [vmem:[%s1538_s5 + $0x10] sm:$0xff] }
  0xd1   : > { %1031 = vmatmul.msk.f32.gmra.mxu0 %vm539_vm0, %v486_v49  ;;  %1039 = vmatmul.msk.f32.gmra.mxu1 %vm539_vm0, %v486_v49  ;;  %v665_v49 = vld [vmem:[%s1538_s5 + $0x18] sm:$0xff] }
  0xd9   : > { %1032 = vmatmul.msk.f32.gmra.mxu0 %vm539_vm0, %v487_v50  ;;  %1040 = vmatmul.msk.f32.gmra.mxu1 %vm539_vm0, %v487_v50  ;;  %v666_v50 = vld [vmem:[%s1538_s5 + $0x20] sm:$0xff] }
  0xe1   : > { %1033 = vmatmul.msk.f32.gmra.mxu0 %vm539_vm0, %v488_v51  ;;  %1041 = vmatmul.msk.f32.gmra.mxu1 %vm539_vm0, %v488_v51  ;;  %v667_v51 = vld [vmem:[%s1538_s5 + $0x28] sm:$0xff] }
  0xe9   : > { %1034 = vmatmul.msk.f32.gmra.mxu0 %vm539_vm0, %v489_v52  ;;  %1042 = vmatmul.msk.f32.gmra.mxu1 %vm539_vm0, %v489_v52  ;;  %v668_v52 = vld [vmem:[%s1538_s5 + $0x30] sm:$0xff] }
  0xf1   : > { %1035 = vmatmul.msk.f32.gmra.mxu0 %vm539_vm0, %v490_v53  ;;  %1043 = vmatmul.msk.f32.gmra.mxu1 %vm539_vm0, %v490_v53  ;;  %v669_v53 = vld [vmem:[%s1538_s5 + $0x38] sm:$0xff] }
 0x136   : > { %v581_v54 = vpop.f32.mrf.mxu0  ;;  %v622_v55 = vpop.f32.mrf.mxu1 }
 0x137   : > { %v582_v38 = vadd.f32 %v581_v54, %v502_v37  ;;  %v623_v39 = vadd.f32 %v622_v55, %v502_v37 }
 0x139   : > { %v646_v44 = vmax.f32 %v582_v38, 0.0  ;;  %v647_v47 = vmax.f32 %v623_v39, 0.0 }
 0x13e   : > { %v584_v56 = vpop.f32.mrf.mxu0  ;;  %v625_v57 = vpop.f32.mrf.mxu1 }
 0x13f   : > { %v585_v33 = vadd.f32 %v584_v56, %v507_v32  ;;  %v626_v34 = vadd.f32 %v625_v57, %v507_v32 }
 0x141   : > { %v648_v42 = vmax.f32 %v585_v33, 0.0  ;;  %v649_v43 = vmax.f32 %v626_v34, 0.0 }
 0x146   : > { %v587_v58 = vpop.f32.mrf.mxu0  ;;  %v628_v59 = vpop.f32.mrf.mxu1 }
 0x147   : > { %v588_v28 = vadd.f32 %v587_v58, %v512_v27  ;;  %v629_v29 = vadd.f32 %v628_v59, %v512_v27  ;;  %v681_v58 = vpop.permute.xlu0 %680  ;;  %v686_v59 = vpop.permute.xlu1 %685 }
 0x149   : > { %v650_v40 = vmax.f32 %v588_v28, 0.0  ;;  %v651_v41 = vmax.f32 %v629_v29, 0.0 }
 0x14e   : > { %v590_v60 = vpop.f32.mrf.mxu0  ;;  %v631_v61 = vpop.f32.mrf.mxu1 }
 0x14f   : > { %v591_v23 = vadd.f32 %v590_v60, %v517_v14  ;;  %v632_v24 = vadd.f32 %v631_v61, %v517_v14  ;;  %v691_v60 = vpop.permute.xlu2 %690 }
 0x151   : > { %v652_v35 = vmax.f32 %v591_v23, 0.0  ;;  %v653_v36 = vmax.f32 %v632_v24, 0.0 }
 0x156   : > { %v593_v62 = vpop.f32.mrf.mxu0  ;;  %v634_v63 = vpop.f32.mrf.mxu1 }
 0x157   : > { %v594_v19 = vadd.f32 %v593_v62, %v522_v7  ;;  %v635_v20 = vadd.f32 %v634_v63, %v522_v7  ;;  %v696_v63 = vpop.permute.xlu0 %695 }
 0x159   : > { %v654_v30 = vmax.f32 %v594_v19, 0.0  ;;  %v655_v31 = vmax.f32 %v635_v20, 0.0 }
 0x15e   : > { %v596_v0 = vpop.f32.mrf.mxu0  ;;  %v637_v1 = vpop.f32.mrf.mxu1 }
 0x15f   : > { %v597_v15 = vadd.f32 %v596_v0, %v527_v6  ;;  %v638_v16 = vadd.f32 %v637_v1, %v527_v6  ;;  %v701_v0 = vpop.permute.xlu1 %700 }
 0x161   : > { %v656_v25 = vmax.f32 %v597_v15, 0.0  ;;  %v657_v26 = vmax.f32 %v638_v16, 0.0 }
 0x166   : > { %v599_v4 = vpop.f32.mrf.mxu0  ;;  %v640_v5 = vpop.f32.mrf.mxu1 }
 0x167   : > { %v600_v10 = vadd.f32 %v599_v4, %v532_v3  ;;  %v641_v11 = vadd.f32 %v640_v5, %v532_v3  ;;  %v851_v3 = vpop.permute.xlu2 %850  ;;  %v856_v4 = vpop.permute.xlu0 %855 }
 0x168   : > { %v861_v7 = vpop.permute.xlu1 %860 }
 0x169   : > { %v658_v21 = vmax.f32 %v600_v10, 0.0  ;;  %v659_v22 = vmax.f32 %v641_v11, 0.0 }
 0x16e   : > { %v602_v8 = vpop.f32.mrf.mxu0  ;;  %v643_v9 = vpop.f32.mrf.mxu1 }
 0x16f   : > { %v603_v12 = vadd.f32 %v602_v8, %v537_v2  ;;  %v644_v13 = vadd.f32 %v643_v9, %v537_v2  ;;  %v706_v8 = vpop.permute.xlu2 %705  ;;  %v866_v11 = vpop.permute.xlu0 %865 }
 0x170   : > { %v711_v24 = vpop.permute.xlu1 %710 }
 0x171   : > { %v660_v17 = vmax.f32 %v603_v12, 0.0  ;;  %v661_v18 = vmax.f32 %v644_v13, 0.0 }
 0x173   : > { %750 = vmatpush.msra.mxu2 %v660_v17  ;;  %791 = vmatpush.msra.mxu3 %v661_v18 }
 0x175   : > { %751 = vmatpush.msra.mxu2 %v658_v21  ;;  %792 = vmatpush.msra.mxu3 %v659_v22 }
 0x177   : > { %752 = vmatpush.msra.mxu2 %v656_v25  ;;  %793 = vmatpush.msra.mxu3 %v657_v26  ;;  %v871_v29 = vpop.permute.xlu2 %870 }
 0x179   : > { %753 = vmatpush.msra.mxu2 %v654_v30  ;;  %794 = vmatpush.msra.mxu3 %v655_v31 }
 0x17b   : > { %754 = vmatpush.msra.mxu2 %v652_v35  ;;  %795 = vmatpush.msra.mxu3 %v653_v36 }
 0x17d   : > { %755 = vmatpush.msra.mxu2 %v650_v40  ;;  %796 = vmatpush.msra.mxu3 %v651_v41 }
 0x17f   : > { %756 = vmatpush.msra.mxu2 %v648_v42  ;;  %797 = vmatpush.msra.mxu3 %v649_v43 }
 0x181   : > { %757 = vmatpush.msra.mxu2 %v646_v44  ;;  %798 = vmatpush.msra.mxu3 %v647_v47 }
 0x182   : > { %1044 = vmatmul.msk.f32.vlgmr.msra.gmra.mxu2 %vm539_vm0, %v662_v48  ;;  %1052 = vmatmul.msk.f32.vlgmr.msra.gmra.mxu3 %vm539_vm0, %v662_v48  ;;  %v716_v48 = vpop.permute.xlu0 %715 }
 0x18a   : > { %1045 = vmatmul.msk.f32.gmra.mxu2 %vm539_vm0, %v663_v45  ;;  %1053 = vmatmul.msk.f32.gmra.mxu3 %vm539_vm0, %v663_v45 }
 0x192   : > { %1046 = vmatmul.msk.f32.gmra.mxu2 %vm539_vm0, %v664_v46  ;;  %1054 = vmatmul.msk.f32.gmra.mxu3 %vm539_vm0, %v664_v46 }
 0x19a   : > { %1047 = vmatmul.msk.f32.gmra.mxu2 %vm539_vm0, %v665_v49  ;;  %1055 = vmatmul.msk.f32.gmra.mxu3 %vm539_vm0, %v665_v49 }
 0x1a2   : > { %1048 = vmatmul.msk.f32.gmra.mxu2 %vm539_vm0, %v666_v50  ;;  %1056 = vmatmul.msk.f32.gmra.mxu3 %vm539_vm0, %v666_v50 }
 0x1aa   : > { %1049 = vmatmul.msk.f32.gmra.mxu2 %vm539_vm0, %v667_v51  ;;  %1057 = vmatmul.msk.f32.gmra.mxu3 %vm539_vm0, %v667_v51 }
 0x1b2   : > { %1050 = vmatmul.msk.f32.gmra.mxu2 %vm539_vm0, %v668_v52  ;;  %1058 = vmatmul.msk.f32.gmra.mxu3 %vm539_vm0, %v668_v52 }
 0x1ba   : > { %1051 = vmatmul.msk.f32.gmra.mxu2 %vm539_vm0, %v669_v53  ;;  %1059 = vmatmul.msk.f32.gmra.mxu3 %vm539_vm0, %v669_v53 }
 0x205   : > { %v759_v54 = vpop.f32.mrf.mxu2  ;;  %v800_v55 = vpop.f32.mrf.mxu3 }
 0x206   : > { %v760_v12 = vadd.f32 %v759_v54, %v681_v58  ;;  %v801_v13 = vadd.f32 %v800_v55, %v681_v58 }
 0x208   : > { %v824_v22 = vmax.f32 %v760_v12, 0.0  ;;  %v825_v23 = vmax.f32 %v801_v13, 0.0  ;;  %v886_v13 = vpop.permute.xlu0 %885 }
 0x20a   : > { %v888_v34 = vmul.f32 %v851_v3, %v824_v22  ;;  %v889_v35 = vmul.f32 %v851_v3, %v825_v23 }
 0x20d   : > { %v762_v56 = vpop.f32.mrf.mxu2  ;;  %v803_v57 = vpop.f32.mrf.mxu3 }
 0x20e   : > { %v763_v9 = vadd.f32 %v762_v56, %v686_v59  ;;  %v804_v10 = vadd.f32 %v803_v57, %v686_v59  ;;  %v876_v59 = vpop.permute.xlu1 %875 }
 0x210   : > { %v826_v18 = vmax.f32 %v763_v9, 0.0  ;;  %v827_v19 = vmax.f32 %v804_v10, 0.0 }
 0x212   : > { %v890_v30 = vmul.f32 %v856_v4, %v826_v18  ;;  %v891_v31 = vmul.f32 %v856_v4, %v827_v19 }
 0x214   : > { %v904_v45 = vadd.f32 %v890_v30, %v888_v34  ;;  %v917_v46 = vadd.f32 %v891_v31, %v889_v35  ;;  %v945_v34 = vlaneseq }
 0x215   : > { %v765_v61 = vpop.f32.mrf.mxu2  ;;  %v806_v62 = vpop.f32.mrf.mxu3 }
 0x216   : > { %v766_v14 = vadd.f32 %v765_v61, %v691_v60  ;;  %v807_v15 = vadd.f32 %v806_v62, %v691_v60  ;;  %v881_v62 = vpop.permute.xlu2 %880  ;;  %vm947_vm2 = vcmp.lt.s32.totalorder %v945_v34, 256 }
 0x218   : > { %v828_v25 = vmax.f32 %v766_v14, 0.0  ;;  %v829_v26 = vmax.f32 %v807_v15, 0.0 }
 0x21a   : > { %v892_v38 = vmul.f32 %v861_v7, %v828_v25  ;;  %v893_v39 = vmul.f32 %v861_v7, %v829_v26 }
 0x21c   : > { %v905_v53 = vadd.f32 %v904_v45, %v892_v38  ;;  %v918_v54 = vadd.f32 %v917_v46, %v893_v39 }
 0x21d   : > { %v768_v1 = vpop.f32.mrf.mxu2  ;;  %v809_v2 = vpop.f32.mrf.mxu3 }
 0x21e   : > { %v769_v20 = vadd.f32 %v768_v1, %v696_v63  ;;  %v810_v21 = vadd.f32 %v809_v2, %v696_v63 }
 0x220   : > { %v830_v32 = vmax.f32 %v769_v20, 0.0  ;;  %v831_v33 = vmax.f32 %v810_v21, 0.0 }
 0x222   : > { %v894_v49 = vmul.f32 %v866_v11, %v830_v32  ;;  %v895_v50 = vmul.f32 %v866_v11, %v831_v33 }
 0x224   : > { %v906_v60 = vadd.f32 %v905_v53, %v894_v49  ;;  %v919_v61 = vadd.f32 %v918_v54, %v895_v50 }
 0x225   : > { %v771_v5 = vpop.f32.mrf.mxu2  ;;  %v812_v6 = vpop.f32.mrf.mxu3 }
 0x226   : > { %v772_v27 = vadd.f32 %v771_v5, %v701_v0  ;;  %v813_v28 = vadd.f32 %v812_v6, %v701_v0 }
 0x228   : > { %v832_v40 = vmax.f32 %v772_v27, 0.0  ;;  %v833_v41 = vmax.f32 %v813_v28, 0.0  ;;  %v934_v28 = vpop.permute.xlu1 %933 }
 0x229   : > { %v936_v31 = vperm.slane %v934_v28, 0 }
 0x22a   : > { %v896_v55 = vmul.f32 %v871_v29, %v832_v40  ;;  %v897_v56 = vmul.f32 %v871_v29, %v833_v41 }
 0x22c   : > { %v907_v1 = vadd.f32 %v906_v60, %v896_v55  ;;  %v920_v2 = vadd.f32 %v919_v61, %v897_v56 }
 0x22d   : > { %v774_v16 = vpop.f32.mrf.mxu2  ;;  %v815_v17 = vpop.f32.mrf.mxu3 }
 0x22e   : > { %v775_v36 = vadd.f32 %v774_v16, %v706_v8  ;;  %v816_v37 = vadd.f32 %v815_v17, %v706_v8 }
 0x230   : > { %v834_v51 = vmax.f32 %v775_v36, 0.0  ;;  %v835_v52 = vmax.f32 %v816_v37, 0.0 }
 0x232   : > { %v898_v63 = vmul.f32 %v876_v59, %v834_v51  ;;  %v899_v0 = vmul.f32 %v876_v59, %v835_v52 }
 0x234   : > { %v908_v9 = vadd.f32 %v907_v1, %v898_v63  ;;  %v921_v10 = vadd.f32 %v920_v2, %v899_v0 }
 0x235   : > { %v777_v42 = vpop.f32.mrf.mxu2  ;;  %v818_v43 = vpop.f32.mrf.mxu3 }
 0x236   : > { %v778_v44 = vadd.f32 %v777_v42, %v711_v24  ;;  %v819_v47 = vadd.f32 %v818_v43, %v711_v24 }
 0x238   : > { %v836_v57 = vmax.f32 %v778_v44, 0.0  ;;  %v837_v58 = vmax.f32 %v819_v47, 0.0 }
 0x23a   : > { %v900_v5 = vmul.f32 %v881_v62, %v836_v57  ;;  %v901_v6 = vmul.f32 %v881_v62, %v837_v58 }
 0x23c   : > { %v909_v14 = vadd.f32 %v908_v9, %v900_v5  ;;  %v922_v15 = vadd.f32 %v921_v10, %v901_v6 }
 0x23d   : > { %v780_v3 = vpop.f32.mrf.mxu2  ;;  %v821_v4 = vpop.f32.mrf.mxu3 }
 0x23e   : > { %v781_v7 = vadd.f32 %v780_v3, %v716_v48  ;;  %v822_v8 = vadd.f32 %v821_v4, %v716_v48 }
 0x240   : > { %v838_v11 = vmax.f32 %v781_v7, 0.0  ;;  %v839_v12 = vmax.f32 %v822_v8, 0.0 }
 0x242   : > { %v902_v16 = vmul.f32 %v886_v13, %v838_v11  ;;  %v903_v17 = vmul.f32 %v886_v13, %v839_v12 }
 0x244   : > { %v910_v18 = vadd.f32 %v909_v14, %v902_v16  ;;  %v923_v19 = vadd.f32 %v922_v15, %v903_v17 }
 0x246   : > { %v911_v20 = vrot.slane %v910_v18, 4  ;;  %v924_v21 = vrot.slane %v923_v19, 4 }
 0x248   : > { %v912_v22 = vadd.f32 %v911_v20, %v910_v18  ;;  %v925_v23 = vadd.f32 %v924_v21, %v923_v19 }
 0x24a   : > { %v913_v24 = vrot.slane %v912_v22, 2  ;;  %v926_v25 = vrot.slane %v925_v23, 2 }
 0x24c   : > { %v914_v26 = vadd.f32 %v913_v24, %v912_v22  ;;  %v927_v27 = vadd.f32 %v926_v25, %v925_v23 }
 0x24e   : > { %v915_v29 = vrot.slane %v914_v26, 1  ;;  %v928_v30 = vrot.slane %v927_v27, 1 }
 0x250   : > { %v916_v32 = vadd.f32 %v915_v29, %v914_v26  ;;  %v929_v33 = vadd.f32 %v928_v30, %v927_v27 }
 0x252   : > { %v938_v35 = vadd.f32 %v936_v31, %v929_v33  ;;  %v937_v36 = vadd.f32 %v936_v31, %v916_v32 }
 0x254   : > { %v941_v37 = vrot.slane %v938_v35, 7 }
 0x256   : > { %v943_v38 = vsel %vm942_vm1, %v937_v36, %v941_v37 }
 0x257   : > { %949 = vst.msk [vmem:[%s326_s27] sm:$0x3] %vm947_vm2, %v943_v38 }
 0x258   : > { %1134 = shalt.err (!%p1131_p3)
}
 0x259   : > { %1064 = dma.vmem_to_hbm [thread:$0]  (%p1262_p5), %s964_s8, 32, %s966_s28, %s951_s29  }
 0x25a PF: > { %p1070_p4 = scmp.ge.s32.totalorder %s1169_s14, 2  ;;  %s977_s18 = sand.u32 1, %s1157_s11  }
 0x25b   : > { %s978_s25 = scalar_lea.sflag [#allocation4], %s977_s18 }
 0x25c   : > { %p1067_p7 = pnand %p1070_p4, %p1266_p6 }
 0x25e   : > { %p1068_p8 = pneg %p1067_p7 }
 0x260   : > { %1152 = dma.done.wait (%p1068_p8), %s978_s25, 32  }
 0x261   : > { %1154 = vsyncadd (%p1068_p8), %s978_s25, 4294967264  ;;  %p21_p9 = scmp.ge.s32.totalorder %s1248_s16, 6   ;;  %s1545_s11 = smov %s1161_s12 }
 0x262   : > { %s1546_s12 = smov %s1165_s13  ;;  %s1547_s13 = smov %s1260_s19 }
 0x263   : > { %s1548_s14 = smov %s1248_s16  ;;  %23 = sbr.rel (!%p21_p9) target bundleno = 6 (0x6), region = 91 }
 0x268   :  { %984 = vsyncpa [#allocation4], 1 }
 0x269   :  { %986 = vsyncpa [#allocation4 + $0x1], 1 }

</bundles_post_ra>
